<compile_context>
chip_gen: v6e
topology: v6e:2x2x1
jax: 0.10.0
libtpu: 0.0.40
codegen_flags: <defaults>
</compile_context>

<pallas_src>
import jax
import jax.numpy as jnp
from jax.experimental import pallas as pl
from jax.experimental.pallas import tpu as pltpu


def _round_up(x, m):
    return ((x + m - 1) // m) * m


def edge_mlp_kernel(src_ref, dest_ref, edge_ref, batch_ref, u_ref,
                    w1s_ref, w1d_ref, w1e_ref, w1u_ref, b1_ref,
                    w2_ref, b2_ref, o_ref):
    """One edge-tile of the GN-block edge MLP (concat + gather fused)."""
    f32 = jnp.float32
    # First Linear as a sum of per-input matmuls == Linear over the concat.
    h = jnp.dot(src_ref[...], w1s_ref[...], preferred_element_type=f32)
    h = h + jnp.dot(dest_ref[...], w1d_ref[...], preferred_element_type=f32)
    h = h + jnp.dot(edge_ref[...], w1e_ref[...], preferred_element_type=f32)

    # u[batch] gather as one-hot @ u (num_graphs is tiny, table is VMEM-resident).
    num_graphs = u_ref.shape[0]
    tile_e = batch_ref.shape[0]
    graph_ids = jax.lax.broadcasted_iota(jnp.int32, (tile_e, num_graphs), 1)
    one_hot = (batch_ref[...] == graph_ids).astype(f32)
    u_e = jnp.dot(one_hot, u_ref[...], preferred_element_type=f32)
    h = h + jnp.dot(u_e, w1u_ref[...], preferred_element_type=f32)

    h = jnp.maximum(h + b1_ref[...], 0.0)
    # TODO(synk): torch.nn.Dropout(0.5) is stochastic in train mode; this
    # implements eval-mode (identity), matching module.eval() semantics.
    out = jnp.dot(h, w2_ref[...], preferred_element_type=f32) + b2_ref[...]
    o_ref[...] = jnp.maximum(out, 0.0).astype(o_ref.dtype)


def edge_model_forward(src, dest, edge_attr, u, batch, params, tile_e=512):
    w1, b1, w2, b2 = params
    E, Fn = src.shape
    Fe = edge_attr.shape[1]
    G, U = u.shape
    H = w1.shape[1]
    Fout = w2.shape[1]
    fin = 2 * Fn + Fe + U
    assert w1.shape[0] == fin

    # Row-split W1 so the torch.cat can be fused into the kernel.
    w1s = w1[:Fn]
    w1d = w1[Fn:2 * Fn]
    w1e = w1[2 * Fn:2 * Fn + Fe]
    w1u = w1[2 * Fn + Fe:]

    # Edge-dimension tiling (multiple of 8 sublanes); pad E to a tile multiple.
    tile_e = int(min(tile_e, max(8, _round_up(E, 8))))
    Ep = _round_up(E, tile_e)
    pad = Ep - E
    if pad:
        src = jnp.pad(src, ((0, pad), (0, 0)))
        dest = jnp.pad(dest, ((0, pad), (0, 0)))
        edge_attr = jnp.pad(edge_attr, ((0, pad), (0, 0)))
        batch = jnp.pad(batch, ((0, pad),))
    batch2d = batch.astype(jnp.int32).reshape(Ep, 1)

    grid = (Ep // tile_e,)

    def edge_spec(cols):
        return pl.BlockSpec((tile_e, cols), lambda i: (i, 0))

    def full_spec(rows, cols):
        return pl.BlockSpec((rows, cols), lambda i: (0, 0))

    cost = pl.CostEstimate(
        flops=2 * E * (fin * H + H * Fout),
        transcendentals=0,
        bytes_accessed=4 * (E * (2 * Fn + Fe + Fout + 1)
                            + G * U + fin * H + H + H * Fout + Fout),
    )

    out = pl.pallas_call(
        edge_mlp_kernel,
        out_shape=jax.ShapeDtypeStruct((Ep, Fout), jnp.float32),
        grid=grid,
        in_specs=[
            edge_spec(Fn),        # src        (tiled over edges)
            edge_spec(Fn),        # dest
            edge_spec(Fe),        # edge_attr
            edge_spec(1),         # batch (int32 column)
            full_spec(G, U),      # u table    (resident across tiles)
            full_spec(Fn, H),     # w1[src rows]
            full_spec(Fn, H),     # w1[dest rows]
            full_spec(Fe, H),     # w1[edge rows]
            full_spec(U, H),      # w1[u rows]
            full_spec(1, H),      # b1
            full_spec(H, Fout),   # w2
            full_spec(1, Fout),   # b2
        ],
        out_specs=edge_spec(Fout),
        compiler_params=pltpu.CompilerParams(
            dimension_semantics=("parallel",)),
        cost_estimate=cost,
    )(src, dest, edge_attr, batch2d, u, w1s, w1d, w1e, w1u, b1, w2, b2)

    return out[:E] if pad else out


def init_params(key, fin, hidden, fout):
    # Deterministic init mimicking torch.nn.Linear (uniform +/- 1/sqrt(fan_in)).
    k1, k2, k3, k4 = jax.random.split(key, 4)
    bound1 = 1.0 / jnp.sqrt(fin)
    bound2 = 1.0 / jnp.sqrt(hidden)
    w1 = jax.random.uniform(k1, (fin, hidden), jnp.float32, -bound1, bound1)
    b1 = jax.random.uniform(k2, (1, hidden), jnp.float32, -bound1, bound1)
    w2 = jax.random.uniform(k3, (hidden, fout), jnp.float32, -bound2, bound2)
    b2 = jax.random.uniform(k4, (1, fout), jnp.float32, -bound2, bound2)
    return w1, b1, w2, b2


if __name__ == "__main__":
    # MUTAG-like sizes: 7 node features, 4 edge features, 3-dim global u.
    num_node_features = 7
    num_edge_features = 4
    u_dim = 3
    hidden_channels = 32
    fin = num_node_features * 2 + num_edge_features + u_dim  # 21

    key = jax.random.PRNGKey(0)
    kp, kdata = jax.random.split(key)
    params = init_params(kp, fin, hidden_channels, num_edge_features)
    w1, b1, w2, b2 = params

    def run_case(num_edges, num_graphs, tile_e, data_key):
        ks, kd, ke, ku, kb = jax.random.split(data_key, 5)
        src = jax.random.normal(ks, (num_edges, num_node_features), jnp.float32)
        dest = jax.random.normal(kd, (num_edges, num_node_features), jnp.float32)
        edge_attr = jax.random.normal(ke, (num_edges, num_edge_features), jnp.float32)
        u = jax.random.normal(ku, (num_graphs, u_dim), jnp.float32)
        batch = jax.random.randint(kb, (num_edges,), 0, num_graphs, jnp.int32)

        out = edge_model_forward(src, dest, edge_attr, u, batch, params,
                                 tile_e=tile_e)
        out = jax.block_until_ready(out)

        # Pure-JAX reference (same math as the PyTorch module in eval mode).
        x = jnp.concatenate([src, dest, edge_attr, u[batch]], axis=1)
        ref = jnp.maximum(jnp.maximum(x @ w1 + b1, 0.0) @ w2 + b2, 0.0)
        assert out.shape == (num_edges, num_edge_features)
        err = float(jnp.max(jnp.abs(out - ref)))
        assert jnp.allclose(out, ref, atol=1e-4, rtol=1e-4), err

    k1, k2 = jax.random.split(kdata)
    # MUTAG-like toy case: 8 edges, 2 graphs (single tile).
    run_case(num_edges=8, num_graphs=2, tile_e=512, data_key=k1)
    # Multi-tile + remainder/padding path: 300 edges, 5 graphs, TILE_E=128.
    run_case(num_edges=300, num_graphs=5, tile_e=128, data_key=k2)

    print("KERNEL_OK")
</pallas_src>

<mosaic_0001>
module attributes {stable_mosaic.version = 11 : i64} {
  func.func @edge_mlp_kernel(%arg0: i32, %arg1: memref<8x7xf32, #tpu.memory_space<vmem>>, %arg2: memref<8x7xf32, #tpu.memory_space<vmem>>, %arg3: memref<8x4xf32, #tpu.memory_space<vmem>>, %arg4: memref<8x1xi32, #tpu.memory_space<vmem>>, %arg5: memref<2x3xf32, #tpu.memory_space<vmem>>, %arg6: memref<7x32xf32, #tpu.memory_space<vmem>>, %arg7: memref<7x32xf32, #tpu.memory_space<vmem>>, %arg8: memref<4x32xf32, #tpu.memory_space<vmem>>, %arg9: memref<3x32xf32, #tpu.memory_space<vmem>>, %arg10: memref<1x32xf32, #tpu.memory_space<vmem>>, %arg11: memref<32x4xf32, #tpu.memory_space<vmem>>, %arg12: memref<1x4xf32, #tpu.memory_space<vmem>>, %arg13: memref<8x4xf32, #tpu.memory_space<vmem>>) attributes {dimension_semantics = [#tpu.dimension_semantics<parallel>], iteration_bounds = array<i64: 1>, scalar_prefetch = 0 : i64, scratch_operands = 0 : i64, tpu.core_type = #tpu.core_type<tc>, window_params = [{transform_indices = @transform_0, window_bounds = array<i64: 8, 7>}, {transform_indices = @transform_1, window_bounds = array<i64: 8, 7>}, {transform_indices = @transform_2, window_bounds = array<i64: 8, 4>}, {transform_indices = @transform_3, window_bounds = array<i64: 8, 1>}, {pipeline_mode = #tpu.pipeline_mode<synchronous>, transform_indices = @transform_4, window_bounds = array<i64: 2, 3>}, {pipeline_mode = #tpu.pipeline_mode<synchronous>, transform_indices = @transform_5, window_bounds = array<i64: 7, 32>}, {pipeline_mode = #tpu.pipeline_mode<synchronous>, transform_indices = @transform_6, window_bounds = array<i64: 7, 32>}, {pipeline_mode = #tpu.pipeline_mode<synchronous>, transform_indices = @transform_7, window_bounds = array<i64: 4, 32>}, {pipeline_mode = #tpu.pipeline_mode<synchronous>, transform_indices = @transform_8, window_bounds = array<i64: 3, 32>}, {pipeline_mode = #tpu.pipeline_mode<synchronous>, transform_indices = @transform_9, window_bounds = array<i64: 1, 32>}, {pipeline_mode = #tpu.pipeline_mode<synchronous>, transform_indices = @transform_10, window_bounds = array<i64: 32, 4>}, {pipeline_mode = #tpu.pipeline_mode<synchronous>, transform_indices = @transform_11, window_bounds = array<i64: 1, 4>}, {transform_indices = @transform_12, window_bounds = array<i64: 8, 4>}]} {
    %c0 = arith.constant 0 : index
    %c0_0 = arith.constant 0 : index
    %0 = vector.load %arg1[%c0, %c0_0] : memref<8x7xf32, #tpu.memory_space<vmem>>, vector<8x7xf32>
    %c0_1 = arith.constant 0 : index
    %c0_2 = arith.constant 0 : index
    %1 = vector.load %arg6[%c0_1, %c0_2] : memref<7x32xf32, #tpu.memory_space<vmem>>, vector<7x32xf32>
    %cst = arith.constant dense<0.000000e+00> : vector<8x32xf32>
    %2 = tpu.matmul %0, %1, %cst {dimension_numbers = #tpu.dot_dimension_numbers<[1], [0], [0], [1], [0, 0, 1, 1], [], []>} : vector<8x7xf32>, vector<7x32xf32>, vector<8x32xf32> -> vector<8x32xf32>
    %c0_3 = arith.constant 0 : index
    %c0_4 = arith.constant 0 : index
    %3 = vector.load %arg2[%c0_3, %c0_4] : memref<8x7xf32, #tpu.memory_space<vmem>>, vector<8x7xf32>
    %c0_5 = arith.constant 0 : index
    %c0_6 = arith.constant 0 : index
    %4 = vector.load %arg7[%c0_5, %c0_6] : memref<7x32xf32, #tpu.memory_space<vmem>>, vector<7x32xf32>
    %cst_7 = arith.constant dense<0.000000e+00> : vector<8x32xf32>
    %5 = tpu.matmul %3, %4, %cst_7 {dimension_numbers = #tpu.dot_dimension_numbers<[1], [0], [0], [1], [0, 0, 1, 1], [], []>} : vector<8x7xf32>, vector<7x32xf32>, vector<8x32xf32> -> vector<8x32xf32>
    %6 = arith.addf %2, %5 : vector<8x32xf32>
    %c0_8 = arith.constant 0 : index
    %c0_9 = arith.constant 0 : index
    %7 = vector.load %arg3[%c0_8, %c0_9] : memref<8x4xf32, #tpu.memory_space<vmem>>, vector<8x4xf32>
    %c0_10 = arith.constant 0 : index
    %c0_11 = arith.constant 0 : index
    %8 = vector.load %arg8[%c0_10, %c0_11] : memref<4x32xf32, #tpu.memory_space<vmem>>, vector<4x32xf32>
    %cst_12 = arith.constant dense<0.000000e+00> : vector<8x32xf32>
    %9 = tpu.matmul %7, %8, %cst_12 {dimension_numbers = #tpu.dot_dimension_numbers<[1], [0], [0], [1], [0, 0, 1, 1], [], []>} : vector<8x4xf32>, vector<4x32xf32>, vector<8x32xf32> -> vector<8x32xf32>
    %10 = arith.addf %6, %9 : vector<8x32xf32>
    %11 = tpu.iota {dimensions = array<i32: 1>} : vector<8x2xi32>
    %c0_13 = arith.constant 0 : index
    %c0_14 = arith.constant 0 : index
    %12 = vector.load %arg4[%c0_13, %c0_14] : memref<8x1xi32, #tpu.memory_space<vmem>>, vector<8x1xi32>
    %13 = vector.broadcast %12 : vector<8x1xi32> to vector<8x2xi32>
    %14 = arith.cmpi eq, %13, %11 : vector<8x2xi32>
    %15 = arith.extui %14 : vector<8x2xi1> to vector<8x2xi32>
    %16 = arith.sitofp %15 : vector<8x2xi32> to vector<8x2xf32>
    %c0_15 = arith.constant 0 : index
    %c0_16 = arith.constant 0 : index
    %17 = vector.load %arg5[%c0_15, %c0_16] : memref<2x3xf32, #tpu.memory_space<vmem>>, vector<2x3xf32>
    %cst_17 = arith.constant dense<0.000000e+00> : vector<8x3xf32>
    %18 = tpu.matmul %16, %17, %cst_17 {dimension_numbers = #tpu.dot_dimension_numbers<[1], [0], [0], [1], [0, 0, 1, 1], [], []>} : vector<8x2xf32>, vector<2x3xf32>, vector<8x3xf32> -> vector<8x3xf32>
    %c0_18 = arith.constant 0 : index
    %c0_19 = arith.constant 0 : index
    %19 = vector.load %arg9[%c0_18, %c0_19] : memref<3x32xf32, #tpu.memory_space<vmem>>, vector<3x32xf32>
    %cst_20 = arith.constant dense<0.000000e+00> : vector<8x32xf32>
    %20 = tpu.matmul %18, %19, %cst_20 {dimension_numbers = #tpu.dot_dimension_numbers<[1], [0], [0], [1], [0, 0, 1, 1], [], []>} : vector<8x3xf32>, vector<3x32xf32>, vector<8x32xf32> -> vector<8x32xf32>
    %21 = arith.addf %10, %20 : vector<8x32xf32>
    %c0_21 = arith.constant 0 : index
    %c0_22 = arith.constant 0 : index
    %22 = vector.load %arg10[%c0_21, %c0_22] : memref<1x32xf32, #tpu.memory_space<vmem>>, vector<1x32xf32>
    %23 = vector.broadcast %22 : vector<1x32xf32> to vector<8x32xf32>
    %24 = arith.addf %21, %23 : vector<8x32xf32>
    %cst_23 = arith.constant 0.000000e+00 : f32
    %25 = vector.broadcast %cst_23 : f32 to vector<8x32xf32>
    %26 = arith.maximumf %24, %25 : vector<8x32xf32>
    %c0_24 = arith.constant 0 : index
    %c0_25 = arith.constant 0 : index
    %27 = vector.load %arg11[%c0_24, %c0_25] : memref<32x4xf32, #tpu.memory_space<vmem>>, vector<32x4xf32>
    %cst_26 = arith.constant dense<0.000000e+00> : vector<8x4xf32>
    %28 = tpu.matmul %26, %27, %cst_26 {dimension_numbers = #tpu.dot_dimension_numbers<[1], [0], [0], [1], [0, 0, 1, 1], [], []>} : vector<8x32xf32>, vector<32x4xf32>, vector<8x4xf32> -> vector<8x4xf32>
    %c0_27 = arith.constant 0 : index
    %c0_28 = arith.constant 0 : index
    %29 = vector.load %arg12[%c0_27, %c0_28] : memref<1x4xf32, #tpu.memory_space<vmem>>, vector<1x4xf32>
    %30 = vector.broadcast %29 : vector<1x4xf32> to vector<8x4xf32>
    %31 = arith.addf %28, %30 : vector<8x4xf32>
    %cst_29 = arith.constant 0.000000e+00 : f32
    %32 = vector.broadcast %cst_29 : f32 to vector<8x4xf32>
    %33 = arith.maximumf %31, %32 : vector<8x4xf32>
    %c0_30 = arith.constant 0 : index
    %c0_31 = arith.constant 0 : index
    %34 = vector.load %arg13[%c0_30, %c0_31] : memref<8x4xf32, #tpu.memory_space<vmem>>, vector<8x4xf32>
    tpu.vector_store %arg13[%c0_30, %c0_31], %33 {strides = array<i32>} : memref<8x4xf32, #tpu.memory_space<vmem>>, vector<8x4xf32>,
    return
  }
  func.func @transform_0(%arg0: i32) -> (i32, i32) {
    %c0_i32 = arith.constant 0 : i32
    %c0_i32_0 = arith.constant 0 : i32
    return %arg0, %c0_i32 : i32, i32
  }
  func.func @transform_1(%arg0: i32) -> (i32, i32) {
    %c0_i32 = arith.constant 0 : i32
    %c0_i32_0 = arith.constant 0 : i32
    return %arg0, %c0_i32 : i32, i32
  }
  func.func @transform_2(%arg0: i32) -> (i32, i32) {
    %c0_i32 = arith.constant 0 : i32
    %c0_i32_0 = arith.constant 0 : i32
    return %arg0, %c0_i32 : i32, i32
  }
  func.func @transform_3(%arg0: i32) -> (i32, i32) {
    %c0_i32 = arith.constant 0 : i32
    %c0_i32_0 = arith.constant 0 : i32
    return %arg0, %c0_i32 : i32, i32
  }
  func.func @transform_4(%arg0: i32) -> (i32, i32) {
    %c0_i32 = arith.constant 0 : i32
    %c0_i32_0 = arith.constant 0 : i32
    %c0_i32_1 = arith.constant 0 : i32
    return %c0_i32, %c0_i32_0 : i32, i32
  }
  func.func @transform_5(%arg0: i32) -> (i32, i32) {
    %c0_i32 = arith.constant 0 : i32
    %c0_i32_0 = arith.constant 0 : i32
    %c0_i32_1 = arith.constant 0 : i32
    return %c0_i32, %c0_i32_0 : i32, i32
  }
  func.func @transform_6(%arg0: i32) -> (i32, i32) {
    %c0_i32 = arith.constant 0 : i32
    %c0_i32_0 = arith.constant 0 : i32
    %c0_i32_1 = arith.constant 0 : i32
    return %c0_i32, %c0_i32_0 : i32, i32
  }
  func.func @transform_7(%arg0: i32) -> (i32, i32) {
    %c0_i32 = arith.constant 0 : i32
    %c0_i32_0 = arith.constant 0 : i32
    %c0_i32_1 = arith.constant 0 : i32
    return %c0_i32, %c0_i32_0 : i32, i32
  }
  func.func @transform_8(%arg0: i32) -> (i32, i32) {
    %c0_i32 = arith.constant 0 : i32
    %c0_i32_0 = arith.constant 0 : i32
    %c0_i32_1 = arith.constant 0 : i32
    return %c0_i32, %c0_i32_0 : i32, i32
  }
  func.func @transform_9(%arg0: i32) -> (i32, i32) {
    %c0_i32 = arith.constant 0 : i32
    %c0_i32_0 = arith.constant 0 : i32
    %c0_i32_1 = arith.constant 0 : i32
    return %c0_i32, %c0_i32_0 : i32, i32
  }
  func.func @transform_10(%arg0: i32) -> (i32, i32) {
    %c0_i32 = arith.constant 0 : i32
    %c0_i32_0 = arith.constant 0 : i32
    %c0_i32_1 = arith.constant 0 : i32
    return %c0_i32, %c0_i32_0 : i32, i32
  }
  func.func @transform_11(%arg0: i32) -> (i32, i32) {
    %c0_i32 = arith.constant 0 : i32
    %c0_i32_0 = arith.constant 0 : i32
    %c0_i32_1 = arith.constant 0 : i32
    return %c0_i32, %c0_i32_0 : i32, i32
  }
  func.func @transform_12(%arg0: i32) -> (i32, i32) {
    %c0_i32 = arith.constant 0 : i32
    %c0_i32_0 = arith.constant 0 : i32
    return %arg0, %c0_i32 : i32, i32
  }
}

</mosaic_0001>

<bundles_post_ra>
// kernel: tpu_custom_call.1
= control target key start
LH: loop header
LB: loop body
LE: loop exit
PB: predicated region body
PF: predicated region fallthrough
CT: control target
= control target key end

     0   :  { %vm49_vm0 = vcmask 1046528   ;;  %v617_v0 = vmov 0   ;;  %v618_v2 = vmov 0.0   ;;  %vm45_vm1 = vcmask 56320   ;;  %s759_s3 = inlined_call_operand.vmem [shape: s32[8,1], index: 3, kind: input, shape index: {}]   ;;  %s760_s6 = inlined_call_operand.vmem [shape: f32[7,32], index: 6, kind: input, shape index: {}]   ;;  %s761_s5 = inlined_call_operand.vmem [shape: f32[7,32], index: 5, kind: input, shape index: {}]   ;;  %s762_s1 = inlined_call_operand.vmem [shape: f32[8,7], index: 1, kind: input, shape index: {}]   ;;  %s763_s0 = inlined_call_operand.vmem [shape: f32[8,7], index: 0, kind: input, shape index: {}]   ;;  %s764_s4 = inlined_call_operand.vmem [shape: f32[2,3], index: 4, kind: input, shape index: {}]   ;;  %s765_s7 = inlined_call_operand.vmem [shape: f32[4,32], index: 7, kind: input, shape index: {}]   ;;  %s766_s2 = inlined_call_operand.vmem [shape: f32[8,4], index: 2, kind: input, shape index: {}]   ;;  %s767_s8 = inlined_call_operand.vmem [shape: f32[3,32], index: 8, kind: input, shape index: {}]   ;;  %s768_s10 = inlined_call_operand.vmem [shape: f32[32,4], index: 10, kind: input, shape index: {}]   ;;  %s769_s9 = inlined_call_operand.vmem [shape: f32[1,32], index: 9, kind: input, shape index: {}]   ;;  %s770_s11 = inlined_call_operand.vmem [shape: f32[1,4], index: 11, kind: input, shape index: {}]   ;;  %s771_s12 = inlined_call_operand.vmem [shape: f32[8,4], index: 12, kind: output, shape index: {}]  }
   0x1   :  { %616 = vset.pattern.permute.xlu0 %v617_v0  ;;  %v282_v1 = vld [vmem:[%s759_s3] sm:$0xff]  ;;  %577 = vmatprep.subr.mxu0 %v618_v2  ;;  %vm619_vm2 = vmmov 0   ;;  %vm294_vm3 = vcmask 1041408   ;;  %vm205_vm4 = vcmask 1043456   ;;  %vm201_vm5 = vcmask 31744   ;;  %v460_v25 = vld [vmem:[%s768_s10 + $0x18] sm:$0xff] }
   0x2   :  { %v44_v3 = vld [vmem:[%s760_s6] sm:$0x7f]  ;;  %284 = vperm.xlu0 %616, %v282_v1   ;;  %582 = vmatprep.subr.mxu1 %v618_v2  ;;  %vm373_vm6 = vcmask 1042432   ;;  %v280_v11 = vlaneseq  ;;  %vm290_vm7 = vcmask 15360   ;;  %vm369_vm9 = vcmask 23552   ;;  %v459_v26 = vld [vmem:[%s768_s10 + $0x10] sm:$0xff] }
   0x3   :  { %v42_v4 = vld [vmem:[%s761_s5] sm:$0x7f]  ;;  %578 = vmatpush3.msk.msra.mxu0 %vm49_vm0, %v44_v3  ;;  %579 = vmatprep.mubr.msk.f32.mxu0 %vm619_vm2, %v618_v2  ;;  %v458_v27 = vld [vmem:[%s768_s10 + $0x8] sm:$0xff]  ;;  %vm468_vm10 = vcmask 261120  }
   0x4   :  { %v43_v5 = vld [vmem:[%s762_s1] sm:$0xff]  ;;  %583 = vmatpush3.msk.msra.mxu1 %vm49_vm0, %v42_v4  ;;  %584 = vmatprep.mubr.msk.f32.mxu1 %vm619_vm2, %v618_v2  ;;  %v281_v12 = vand.u32 127, %v280_v11 }
   0x5   :  { %v41_v6 = vld [vmem:[%s763_s0] sm:$0xff]  ;;  %580 = vmatmul.mubr.msk.f32.vlgmr.msra.gmra.mxu0 %vm45_vm1, %v43_v5  ;;  %592 = vmatprep.subr.mxu1 %v618_v2 }
   0x6   :  { %v289_v7 = vld [vmem:[%s764_s4] sm:$0x3]  ;;  %585 = vmatmul.mubr.msk.f32.vlgmr.msra.gmra.mxu1 %vm45_vm1, %v41_v6  ;;  %587 = vmatprep.subr.mxu0 %v618_v2 }
   0x7   :  { %v200_v8 = vld [vmem:[%s765_s7] sm:$0xf]  ;;  %593 = vmatpush3.msk.msra.mxu1 %vm294_vm3, %v289_v7  ;;  %589 = vmatprep.mubr.msk.f32.mxu0 %vm619_vm2, %v618_v2 }
   0x8   :  { %v199_v9 = vld [vmem:[%s766_s2] sm:$0xff]  ;;  %588 = vmatpush3.msk.msra.mxu0 %vm205_vm4, %v200_v8  ;;  %594 = vmatprep.mubr.msk.f32.mxu1 %vm619_vm2, %v618_v2 }
   0x9   :  { %590 = vmatmul.mubr.msk.f32.vlgmr.msra.gmra.mxu0 %vm201_vm5, %v199_v9  ;;  %597 = vmatprep.subr.mxu0 %v618_v2  ;;  %v368_v10 = vld [vmem:[%s767_s8] sm:$0x7] }
   0xa   :  { %599 = vmatprep.mubr.msk.f32.mxu0 %vm619_vm2, %v618_v2  ;;  %602 = vmatprep.subr.mxu1 %v618_v2  ;;  %v457_v28 = vld [vmem:[%s768_s10] sm:$0xff] }
   0xb   :  { %598 = vmatpush3.msk.msra.mxu0 %vm373_vm6, %v368_v10  ;;  %v559_v30 = vld [vmem:[%s769_s9] ss:$0 sm:$0xff] }
   0xc   :  { %v560_v35 = vld [vmem:[%s770_s11] ss:$0 sm:$0xff] }
  0x7d   :  { %v285_v13 = vpop.permute.xlu0 %284 }
  0x7e   :  { %vm286_vm8 = vcmp.eq.s32.totalorder %v285_v13, %v281_v12 }
  0x7f   :  { %v554_v14 = vsel %vm286_vm8, 1.0, %v618_v2 }
  0x80   :  { %595 = vmatmul.mubr.msk.f32.vlgmr.msra.gmra.mxu1 %vm290_vm7, %v554_v14 }
  0x81   :  { %610 = vmatprep.mubr.msk.f32.mxu1 %vm619_vm2, %v618_v2  ;;  %603 = vmatpush3.msra.mxu1 %v460_v25 }
  0x82   :  { %604 = vmatprep.subr.mxu1 %v618_v2 }
  0x83   :  { %605 = vmatpush3.msra.mxu1 %v459_v26 }
  0x84   :  { %606 = vmatprep.subr.mxu1 %v618_v2 }
  0x85   :  { %607 = vmatpush3.msra.mxu1 %v458_v27 }
  0x86   :  { %608 = vmatprep.subr.mxu1 %v618_v2 }
  0x87   :  { %609 = vmatpush3.msra.mxu1 %v457_v28 }
  0xc5   :  { %v119_v15 = vpop.f32.mrf.mxu0 }
  0xc6   :  { %v195_v16 = vpop.f32.mrf.mxu1 }
  0xc7   :  { %v196_v17 = vadd.f32 %v195_v16, %v119_v15  ;;  %v581_v18 = vpop.f32.mrf.mxu0 }
  0xc8   :  { %v586_v19 = vpop.f32.mrf.mxu1 }
  0xc9   :  { %v275_v20 = vpop.f32.mrf.mxu0 }
  0xca   :  { %v279_v21 = vadd.f32 %v275_v20, %v196_v17 }
  0xcb   :  { %v591_v22 = vpop.f32.mrf.mxu0 }
 0x140   :  { %v364_v23 = vpop.f32.mrf.mxu1 }
 0x141   :  { %600 = vmatmul.mubr.msk.f32.vlgmr.msra.gmra.mxu0 %vm369_vm9, %v364_v23 }
 0x142   :  { %v596_v24 = vpop.f32.mrf.mxu1 }
 0x201   :  { %v443_v29 = vpop.f32.mrf.mxu0 }
 0x202   :  { %v447_v31 = vadd.f32 %v443_v29, %v279_v21 }
 0x203   :  { %v601_v32 = vpop.f32.mrf.mxu0 }
 0x204   :  { %v455_v33 = vadd.f32 %v559_v30, %v447_v31 }
 0x206   :  { %v456_v34 = vmax.f32 %v455_v33, 0.0 }
 0x208   :  { %611 = vmatmul.mubr.msk.f32.vlgmr.msra.gmra.mxu1 %vm468_vm10, %v456_v34 }
 0x2c8   :  { %v538_v36 = vpop.f32.mrf.mxu1 }
 0x2c9   :  { %v539_v37 = vadd.f32 %v560_v35, %v538_v36 }
 0x2ca   :  { %v612_v38 = vpop.f32.mrf.mxu1 }
 0x2cb   :  { %v542_v39 = vmax.f32 %v539_v37, 0.0 }
 0x2cd   :  { %543 = vst.msk [vmem:[%s771_s12] sm:$0xff] %vm201_vm5, %v542_v39 }

</bundles_post_ra>
